<compile_context>
chip_gen: v6e
topology: v6e:2x2x1
jax: 0.10.0
libtpu: 0.0.40
codegen_flags: <defaults>
</compile_context>

<pallas_src>
import jax
import jax.numpy as jnp
from jax.experimental import pallas as pl
from jax.experimental.pallas import tpu as pltpu


def _bce_with_logits(z, t):
    # Numerically-stable BCEWithLogits, identical to torch.nn.BCEWithLogitsLoss
    # per element: max(z, 0) - z*t + log(1 + exp(-|z|))
    return jnp.maximum(z, 0.0) - z * t + jnp.log1p(jnp.exp(-jnp.abs(z)))


def _symbolic_consistency_kernel(scale_ref, x_ref, out_ref):
    # scale_ref: (1, 1) f32 SMEM holding 0.5 * loss_weight / B.
    # x_ref:     (3, B) f32 VMEM. row 0: consistency view1, row 1: view2,
    #            row 2: raw ground-truth labels.
    c1 = x_ref[0:1, :]                                    # (1, B)
    c2 = x_ref[1:2, :]                                    # (1, B)
    t = jnp.where(x_ref[2:3, :] == 1.0, 1.0, 0.0)         # target = 1.0 iff label == 1

    # Two half passes sharing the same target (no in-kernel concat / VMEM temp).
    l1 = _bce_with_logits(c1 * 20.0 - 10.0, t)
    l2 = _bce_with_logits(c2 * 20.0 - 10.0, t)

    out_ref[0, 0] = (jnp.sum(l1) + jnp.sum(l2)) * scale_ref[0, 0]


def symbolic_consistency_loss(consistency1, consistency2, labels,
                              loss_weight: float = 1.0):
    """consistency1/2: (B,) floats (nominally {0,1}); labels: (B,) int/float of {0,1}."""
    B = labels.shape[0]
    if B == 0:                                # num_evaluated_problems == 0
        return jnp.float32(0.0)

    # Single (3, B) input slab: one HBM->VMEM DMA, no wrapper-side padding.
    stacked = jnp.stack([
        jnp.asarray(consistency1, jnp.float32).reshape(-1),
        jnp.asarray(consistency2, jnp.float32).reshape(-1),
        jnp.asarray(labels, jnp.float32).reshape(-1),
    ], axis=0)

    # 0.5 (view average) * loss_weight * 1/B (mean over problems), as SMEM scalar.
    scale = jnp.full((1, 1), 0.5 * float(loss_weight) / B, jnp.float32)

    out = pl.pallas_call(
        _symbolic_consistency_kernel,
        out_shape=jax.ShapeDtypeStruct((1, 1), jnp.float32),
        in_specs=[
            pl.BlockSpec(memory_space=pltpu.MemorySpace.SMEM),   # scale scalar
            pl.BlockSpec(memory_space=pltpu.MemorySpace.VMEM),   # whole (3,B) array
        ],
        out_specs=pl.BlockSpec(memory_space=pltpu.MemorySpace.SMEM),
        cost_estimate=pl.CostEstimate(
            flops=20 * B,
            transcendentals=4 * B,            # exp + log1p per element, two views
            bytes_accessed=4 * 3 * B + 8,
        ),
    )(scale, stacked)
    return out[0, 0]


def _reference(consistency1, consistency2, labels, loss_weight=1.0):
    c1 = jnp.asarray(consistency1, jnp.float32)
    c2 = jnp.asarray(consistency2, jnp.float32)
    t = (jnp.asarray(labels) == 1).astype(jnp.float32)
    l1 = _bce_with_logits(c1 * 20.0 - 10.0, t)
    l2 = _bce_with_logits(c2 * 20.0 - 10.0, t)
    return jnp.mean(0.5 * (l1 + l2)) * loss_weight


if __name__ == "__main__":
    key = jax.random.PRNGKey(0)
    k1, k2, k3 = jax.random.split(key, 3)

    B = 8  # number of Bongard problems in the batch
    # Precomputed (synthetic) symbolic-engine verdicts for each view.
    consistency1 = jax.random.bernoulli(k1, 0.5, (B,)).astype(jnp.float32)
    consistency2 = jax.random.bernoulli(k2, 0.5, (B,)).astype(jnp.float32)
    labels = jax.random.bernoulli(k3, 0.5, (B,)).astype(jnp.int32)

    loss = symbolic_consistency_loss(consistency1, consistency2, labels,
                                     loss_weight=1.0)
    loss = jax.block_until_ready(loss)

    ref = _reference(consistency1, consistency2, labels, loss_weight=1.0)
    assert jnp.allclose(loss, ref, atol=1e-5, rtol=1e-5), (loss, ref)

    print("KERNEL_OK")
</pallas_src>

<mosaic_0001>
module attributes {stable_mosaic.version = 11 : i64} {
  func.func @_symbolic_consistency_kernel(%arg0: memref<1x1xf32, #tpu.memory_space<smem>>, %arg1: memref<3x8xf32, #tpu.memory_space<vmem>>, %arg2: memref<1x1xf32, #tpu.memory_space<smem>>) attributes {dimension_semantics = [], scalar_prefetch = 0 : i64, scratch_operands = 0 : i64, tpu.core_type = #tpu.core_type<tc>} {
    %c0 = arith.constant 0 : index
    %c0_0 = arith.constant 0 : index
    %0 = vector.load %arg1[%c0, %c0_0] : memref<3x8xf32, #tpu.memory_space<vmem>>, vector<1x8xf32>
    %c1 = arith.constant 1 : index
    %c0_1 = arith.constant 0 : index
    %1 = vector.load %arg1[%c1, %c0_1] : memref<3x8xf32, #tpu.memory_space<vmem>>, vector<1x8xf32>
    %c2 = arith.constant 2 : index
    %c0_2 = arith.constant 0 : index
    %2 = vector.load %arg1[%c2, %c0_2] : memref<3x8xf32, #tpu.memory_space<vmem>>, vector<1x8xf32>
    %cst = arith.constant 1.000000e+00 : f32
    %3 = vector.broadcast %cst : f32 to vector<1x8xf32>
    %4 = arith.cmpf oeq, %2, %3 : vector<1x8xf32>
    %cst_3 = arith.constant 1.000000e+00 : f32
    %cst_4 = arith.constant 0.000000e+00 : f32
    %5 = vector.broadcast %cst_3 : f32 to vector<1x8xf32>
    %6 = vector.broadcast %cst_4 : f32 to vector<1x8xf32>
    %7 = arith.select %4, %5, %6 : vector<1x8xi1>, vector<1x8xf32>
    %cst_5 = arith.constant 2.000000e+01 : f32
    %8 = vector.broadcast %cst_5 : f32 to vector<1x8xf32>
    %9 = arith.mulf %0, %8 : vector<1x8xf32>
    %cst_6 = arith.constant 1.000000e+01 : f32
    %10 = vector.broadcast %cst_6 : f32 to vector<1x8xf32>
    %11 = arith.subf %9, %10 : vector<1x8xf32>
    %cst_7 = arith.constant 0.000000e+00 : f32
    %12 = vector.broadcast %cst_7 : f32 to vector<1x8xf32>
    %13 = arith.maximumf %11, %12 : vector<1x8xf32>
    %14 = arith.mulf %11, %7 : vector<1x8xf32>
    %15 = arith.subf %13, %14 : vector<1x8xf32>
    %16 = math.absf %11 : vector<1x8xf32>
    %cst_8 = arith.constant 0.000000e+00 : f32
    %17 = vector.broadcast %cst_8 : f32 to vector<1x8xf32>
    %18 = arith.subf %17, %16 : vector<1x8xf32>
    %19 = math.exp %18 : vector<1x8xf32>
    %20 = math.log1p %19 : vector<1x8xf32>
    %21 = arith.addf %15, %20 : vector<1x8xf32>
    %cst_9 = arith.constant 2.000000e+01 : f32
    %22 = vector.broadcast %cst_9 : f32 to vector<1x8xf32>
    %23 = arith.mulf %1, %22 : vector<1x8xf32>
    %cst_10 = arith.constant 1.000000e+01 : f32
    %24 = vector.broadcast %cst_10 : f32 to vector<1x8xf32>
    %25 = arith.subf %23, %24 : vector<1x8xf32>
    %cst_11 = arith.constant 0.000000e+00 : f32
    %26 = vector.broadcast %cst_11 : f32 to vector<1x8xf32>
    %27 = arith.maximumf %25, %26 : vector<1x8xf32>
    %28 = arith.mulf %25, %7 : vector<1x8xf32>
    %29 = arith.subf %27, %28 : vector<1x8xf32>
    %30 = math.absf %25 : vector<1x8xf32>
    %cst_12 = arith.constant 0.000000e+00 : f32
    %31 = vector.broadcast %cst_12 : f32 to vector<1x8xf32>
    %32 = arith.subf %31, %30 : vector<1x8xf32>
    %33 = math.exp %32 : vector<1x8xf32>
    %34 = math.log1p %33 : vector<1x8xf32>
    %35 = arith.addf %29, %34 : vector<1x8xf32>
    %36 = vector.shape_cast %21 : vector<1x8xf32> to vector<1x1x8xf32>
    %cst_13 = arith.constant dense<0.000000e+00> : vector<1xf32>
    %37 = vector.multi_reduction <add>, %36, %cst_13 [1, 2] : vector<1x1x8xf32> to vector<1xf32>
    %38 = vector.shape_cast %37 : vector<1xf32> to vector<1x1x1xf32>
    %39 = vector.extract %38[0, 0, 0] : f32 from vector<1x1x1xf32>
    %40 = vector.shape_cast %35 : vector<1x8xf32> to vector<1x1x8xf32>
    %cst_14 = arith.constant dense<0.000000e+00> : vector<1xf32>
    %41 = vector.multi_reduction <add>, %40, %cst_14 [1, 2] : vector<1x1x8xf32> to vector<1xf32>
    %42 = vector.shape_cast %41 : vector<1xf32> to vector<1x1x1xf32>
    %43 = vector.extract %42[0, 0, 0] : f32 from vector<1x1x1xf32>
    %44 = arith.addf %39, %43 : f32
    %c0_15 = arith.constant 0 : index
    %c0_16 = arith.constant 0 : index
    %45 = memref.load %arg0[%c0_15, %c0_16] : memref<1x1xf32, #tpu.memory_space<smem>>
    %46 = arith.mulf %44, %45 : f32
    %c0_17 = arith.constant 0 : index
    %c0_18 = arith.constant 0 : index
    %47 = memref.load %arg2[%c0_17, %c0_18] : memref<1x1xf32, #tpu.memory_space<smem>>
    memref.store %46, %arg2[%c0_17, %c0_18] : memref<1x1xf32, #tpu.memory_space<smem>>
    return
  }
}

</mosaic_0001>

<bundles_post_ra>
// kernel: tpu_custom_call.1
= control target key start
LH: loop header
LB: loop body
LE: loop exit
PB: predicated region body
PF: predicated region fallthrough
CT: control target
= control target key end

     0   :  { %8 = vsyncpa [#allocation4], 0  ;;  %s184_s0 = inlined_call_operand.<no memory space> [shape: f32[1,1], index: 0, kind: input, shape index: {}]   ;;  %s185_s1 = inlined_call_operand.hbm [shape: f32[3,8], index: 1, kind: input, shape index: {}]   ;;  %s186_s2 = inlined_call_operand.hbm [shape: f32[1,1], index: 2, kind: output, shape index: {}]  }
   0x1   :  { %9 = vsyncpa [#allocation5], 0  ;;  %s157_s9 = smov [#allocation3]  }
   0x2   :  { %s18_s10 = sshll.u32 %s157_s9, 4  ;;  %s19_s10 = int_to_ptr.vmem [resolvable:$true] %s18_s10 }
   0x3   :  { %s133_s11 = scalar_lea.vmem %s19_s10, 64  ;;  %p138_p1 = scmp.lt.s32.totalorder %s19_s10, %s19_s10 }
   0x4   :  { %p134_p0 = scmp.ne.s32.totalorder %s19_s10, %s133_s11  ;;  %p139_p2 = scmp.lt.s32.totalorder %s133_s11, %s133_s11 }
   0x6   :  { %p140_p3 = por %p139_p2, %p138_p1 }
   0x8   :  { %p141_p4 = pnand %p140_p3, %p134_p0 }
   0xa   :  { %144 = shalt.err (!%p141_p4)
}
   0xb   :  { %21 = dma.hbm_to_vmem [thread:$0]  %s185_s1, 64, %s19_s10, [#allocation4]  }
   0xc   :  { %153 = dma.done.wait [#allocation4], 64  }
   0xd   :  { %154 = vsyncadd [#allocation4], 4294967232  ;;  %v25_v0 = vld [vmem:[#allocation3] sm:$0x1]  ;;  %v26_v1 = vld [vmem:[#allocation3 + $0x1] sm:$0x1] }
   0xe   :  { %v30_v2 = vmul.f32 20.0, %v25_v0  ;;  %v49_v3 = vmul.f32 20.0, %v26_v1  ;;  %v27_v16 = vld [vmem:[#allocation3 + $0x2] sm:$0x1]  ;;  %v158_v19 = vmov 0.0   ;;  %vm68_vm3 = vcmask 57344  }
   0xf   :  { %vm28_vm0 = vcmp.eq.f32.partialorder %v27_v16, 1.0  ;;  %s159_s19 = smov [#allocation6]  }
  0x10   :  { %v108_v4 = vadd.f32 -10.0, %v30_v2  ;;  %v109_v5 = vadd.f32 -10.0, %v49_v3  ;;  %v29_v20 = vsel %vm28_vm0, 1.0, %v158_v19 }
  0x12   :  { %v35_v6 = vand.u32 2147483647, %v108_v4  ;;  %v54_v7 = vand.u32 2147483647, %v109_v5  ;;  %v32_v22 = vmax.f32 %v108_v4, 0.0  ;;  %v33_v23 = vmul.f32 %v108_v4, %v29_v20 }
  0x13   :  { %v51_v26 = vmax.f32 %v109_v5, 0.0  ;;  %v52_v27 = vmul.f32 %v109_v5, %v29_v20 }
  0x14   :  { %v36_v8 = vsub.f32 0.0, %v35_v6  ;;  %v55_v9 = vsub.f32 0.0, %v54_v7  ;;  %v34_v31 = vsub.f32 %v32_v22, %v33_v23 }
  0x15   :  { %v53_v35 = vsub.f32 %v51_v26, %v52_v27 }
  0x16   :  { %v37_v10 = vmul.f32 1.442695, %v36_v8  ;;  %v56_v11 = vmul.f32 1.442695, %v55_v9 }
  0x18   :  { %117 = vpow2.f32 %v37_v10 }
  0x19   :  { %119 = vpow2.f32 %v56_v11 }
  0x25   :  { %v118_v12 = vpop.eup %117 }
  0x26   :  { %v120_v13 = vpop.eup %119  ;;  %v39_v14 = vadd.f32 1.0, %v118_v12  ;;  %v42_v17 = vmul.f32 -0.5, %v118_v12  ;;  %v45_v24 = vand.u32 2147483647, %v118_v12 }
  0x27   :  { %v58_v15 = vadd.f32 1.0, %v120_v13  ;;  %v61_v18 = vmul.f32 -0.5, %v120_v13  ;;  %v64_v28 = vand.u32 2147483647, %v120_v13 }
  0x28   :  { %121 = vlog2.f32 %v39_v14  ;;  %v43_v21 = vadd.f32 1.0, %v42_v17  ;;  %vm46_vm1 = vcmp.lt.f32.partialorder %v45_v24, 0.0004427343 }
  0x29   :  { %123 = vlog2.f32 %v58_v15  ;;  %v62_v25 = vadd.f32 1.0, %v61_v18  ;;  %vm65_vm2 = vcmp.lt.f32.partialorder %v64_v28, 0.0004427343 }
  0x2a   :  { %v44_v29 = vmul.f32 %v118_v12, %v43_v21 }
  0x2b   :  { %v63_v32 = vmul.f32 %v120_v13, %v62_v25 }
  0x35   :  { %v122_v30 = vpop.eup %121 }
  0x36   :  { %v124_v33 = vpop.eup %123  ;;  %v41_v34 = vmul.f32 0.6931472, %v122_v30 }
  0x37   :  { %v60_v36 = vmul.f32 0.6931472, %v124_v33 }
  0x38   :  { %v47_v37 = vsel %vm46_vm1, %v44_v29, %v41_v34 }
  0x39   :  { %v48_v38 = vadd.f32 %v47_v37, %v34_v31  ;;  %v66_v39 = vsel %vm65_vm2, %v63_v32, %v60_v36 }
  0x3a   :  { %v67_v40 = vadd.f32 %v66_v39, %v53_v35 }
  0x3b   :  { %v69_v41 = vsel %vm68_vm3, %v48_v38, 0.0 }
  0x3c   :  { %70 = vadd.xlane.f32.xlu0 %v69_v41  ;;  %v79_v42 = vsel %vm68_vm3, %v67_v40, 0.0 }
  0x40   :  { %80 = vadd.xlane.f32.xlu0 %v79_v42 }
  0xc5   :  { %v71_v43 = vpop.xlane.xlu0 %70 }
  0xc6   :  { %v72_v44 = vrot.slane %v71_v43, 4 }
  0xc8   :  { %v73_v45 = vadd.f32 %v72_v44, %v71_v43 }
  0xc9   :  { %v81_v46 = vpop.xlane.xlu0 %80 }
  0xca   :  { %v74_v47 = vrot.slane %v73_v45, 2  ;;  %v82_v48 = vrot.slane %v81_v46, 4 }
  0xcc   :  { %v83_v49 = vadd.f32 %v82_v48, %v81_v46  ;;  %v75_v50 = vadd.f32 %v74_v47, %v73_v45 }
  0xce   :  { %v84_v51 = vrot.slane %v83_v49, 2  ;;  %v76_v52 = vrot.slane %v75_v50, 1 }
  0xd0   :  { %v85_v53 = vadd.f32 %v84_v51, %v83_v49  ;;  %v77_v54 = vadd.f32 %v76_v52, %v75_v50 }
  0xd2   :  { %110 = vpush %v77_v54  ;;  %v86_v55 = vrot.slane %v85_v53, 1 }
  0xd4   :  { %v87_v56 = vadd.f32 %v86_v55, %v85_v53 }
  0xd6   :  { %112 = vpush %v87_v56 }
 0x103   :  { %s111_s1 = spop %110 }
 0x107   :  { %s113_s14 = spop %112 }
 0x108   :  { %s89_s15 = sadd.f32 %s113_s14, %s111_s1 }
 0x10a   :  { %s91_s18 = smul.f32 %s89_s15, %s184_s0 }
 0x10c   :  { %93 = sst [smem:[#allocation6]] %s91_s18 }
 0x10d   :  { %101 = dma.smem_to_hbm %s159_s19, 16, %s186_s2, [#allocation5]  }
 0x10e   :  { %155 = dma.done.wait [#allocation5], 16  }
 0x10f   :  { %156 = vsyncadd [#allocation5], 4294967280 }
 0x110   :  { %105 = sfence }
 0x111   :  { %106 = vsyncpa [#allocation4], 1 }
 0x112   :  { %107 = vsyncpa [#allocation5], 1 }

</bundles_post_ra>
